<compile_context>
chip_gen: v7x
topology: tpu7x:2x2x1
jax: 0.10.0
libtpu: 0.0.40
codegen_flags: <defaults>
</compile_context>

<pallas_src>
import numpy as np
import jax
import jax.numpy as jnp
from jax.experimental import pallas as pl
from jax.experimental.pallas import tpu as pltpu


def _round_up(x, m):
    return ((x + m - 1) // m) * m


def _largest_block(total, cap):
    """Largest multiple-of-128 divisor of `total` (itself a multiple of 128)
    that is <= cap.  128 always qualifies, so no padding / partial blocks."""
    cap = max(128, (cap // 128) * 128)
    best = 128
    for t in range(128, cap + 1, 128):
        if total % t == 0:
            best = t
    return best


# ----------------------------------------------------------------------------
# Generation-aware VMEM configuration (review: v5e/v6e can go far bigger than
# v7x, which only has 64 MiB of VMEM per TensorCore).
# ----------------------------------------------------------------------------
_VMEM_CFG = None


def _vmem_config():
    global _VMEM_CFG
    if _VMEM_CFG is not None:
        return _VMEM_CFG
    vmem_bytes = 0
    try:  # capability query only; conservative (v7x-sized) fallback if unavailable
        vmem_bytes = int(getattr(pltpu.get_tpu_info(), "vmem_capacity_bytes", 0) or 0)
    except Exception:
        vmem_bytes = 0
    if vmem_bytes >= (100 << 20):
        # v5e / v6e: 128 MiB physical VMEM -> bigger resident weights & tiles.
        _VMEM_CFG = dict(budget=72 << 20, limit=96 << 20, tm_cap=1024,
                         weight_resident_max=48 << 20, min_steps=2)
    else:
        # v7x (64 MiB/TC) or unknown: conservative budget, cap tm at 512 and
        # require >=4 row-grid steps so both TensorCores keep a pipeline.
        _VMEM_CFG = dict(budget=24 << 20, limit=32 << 20, tm_cap=512,
                         weight_resident_max=16 << 20, min_steps=4)
    return _VMEM_CFG


# ----------------------------------------------------------------------------
# One-time feature probe: single-buffered (grid-invariant) weight BlockSpec.
# Replaces the fragile try/except around the real pallas_call.
# ----------------------------------------------------------------------------
_BUFFERED1_OK = None


def _single_buffer_weights_supported():
    global _BUFFERED1_OK
    if _BUFFERED1_OK is not None:
        return _BUFFERED1_OK

    def _probe_kernel(a_ref, b_ref, o_ref):
        o_ref[...] = a_ref[...] + b_ref[...]

    try:
        f = pl.pallas_call(
            _probe_kernel,
            out_shape=jax.ShapeDtypeStruct((16, 128), jnp.float32),
            grid=(2,),
            in_specs=[pl.BlockSpec((8, 128), lambda i: (i, 0)),
                      pl.BlockSpec((8, 128), lambda i: (0, 0),
                                   pipeline_mode=pl.Buffered(1))],
            out_specs=pl.BlockSpec((8, 128), lambda i: (i, 0)),
        )
        jax.block_until_ready(f(jnp.zeros((16, 128), jnp.float32),
                                jnp.zeros((8, 128), jnp.float32)))
        _BUFFERED1_OK = True
    except Exception:
        _BUFFERED1_OK = False
    return _BUFFERED1_OK


# ----------------------------------------------------------------------------
# Pallas kernels.
# ----------------------------------------------------------------------------
def _analysis_matmul_kernel(x_ref, w_ref, o_ref):
    # LHS stays f32 in HBM; the cast to the (possibly bf16) weight dtype runs
    # on the VPU inside the kernel -- free under an MXU/DMA-bound loop and
    # avoids a standalone XLA cast pass over x.
    o_ref[...] = jnp.dot(x_ref[...].astype(w_ref.dtype), w_ref[...],
                         preferred_element_type=jnp.float32)


def _analysis_matmul_kernel_tiled(x_ref, w_ref, o_ref, acc_ref):
    @pl.when(pl.program_id(2) == 0)
    def _():
        acc_ref[...] = jnp.zeros_like(acc_ref)

    acc_ref[...] += jnp.dot(x_ref[...].astype(w_ref.dtype), w_ref[...],
                            preferred_element_type=jnp.float32)

    @pl.when(pl.program_id(2) == pl.num_programs(2) - 1)
    def _():
        o_ref[...] = acc_ref[...]


def _pick_tm(M_pad, avail_bytes, per_row_bytes, cfg):
    tm_max = min(cfg["tm_cap"],
                 max(128, (avail_bytes // per_row_bytes) // 128 * 128))
    steps = min(cfg["min_steps"], M_pad // 128)
    if steps > 1:
        tm_max = min(tm_max, max(128, (M_pad // steps) // 128 * 128))
    return _largest_block(M_pad, tm_max)


def analysis_matmul(x2d, w2d, *, force_tiled=False, block_overrides=None):
    """(M, K) @ (K, N) -> (M, N) f32.  N must be a multiple of 128 (lane-dense
    stores).  M is padded only to the next multiple of 128 when needed."""
    M, K = x2d.shape
    Kw, N = w2d.shape
    assert K == Kw
    assert N % 128 == 0, "pad the fused atom matrix to a lane-dense multiple of 128"

    cfg = _vmem_config()
    lhs_b = jnp.dtype(x2d.dtype).itemsize
    w_b = jnp.dtype(w2d.dtype).itemsize

    # Pad rows only to the next multiple of 128 (<=127 rows); tm is then chosen
    # among multiple-of-128 divisors of M_pad, so no pad-to-tm copy is needed.
    M_pad = _round_up(M, 128)
    if M_pad != M:
        x2d = jnp.pad(x2d, ((0, M_pad - M), (0, 0)))

    weight_bytes = K * N * w_b
    params = dict(vmem_limit_bytes=cfg["limit"])

    tiled = bool(force_tiled)
    single_buf = False
    if not tiled:
        single_buf = _single_buffer_weights_supported()
        resident = weight_bytes * (1 if single_buf else 2)
        min_tile_bytes = 128 * (2 * K * lhs_b + 2 * N * 4)
        if (resident > cfg["weight_resident_max"]
                or resident + min_tile_bytes > cfg["budget"]):
            tiled = True

    if not tiled:
        # --- Path A: full fused weight resident in VMEM, row-tiled grid. ----
        fixed = weight_bytes * (1 if single_buf else 2)
        per_row = 2 * K * lhs_b + 2 * N * 4            # dbuf LHS tile + dbuf f32 out
        avail = max(cfg["budget"] - fixed, 128 * per_row)
        tm = _pick_tm(M_pad, avail, per_row, cfg)

        if single_buf:
            w_spec = pl.BlockSpec((K, N), lambda i: (0, 0),
                                  pipeline_mode=pl.Buffered(1))
        else:
            w_spec = pl.BlockSpec((K, N), lambda i: (0, 0))

        cost = pl.CostEstimate(
            flops=2 * M_pad * K * N, transcendentals=0,
            bytes_accessed=M_pad * K * lhs_b + K * N * w_b + M_pad * N * 4)

        y = pl.pallas_call(
            _analysis_matmul_kernel,
            out_shape=jax.ShapeDtypeStruct((M_pad, N), jnp.float32),
            grid=(M_pad // tm,),
            in_specs=[pl.BlockSpec((tm, K), lambda i: (i, 0)), w_spec],
            out_specs=pl.BlockSpec((tm, N), lambda i: (i, 0)),
            compiler_params=pltpu.CompilerParams(
                dimension_semantics=("parallel",), **params),
            cost_estimate=cost,
        )(x2d, w2d)
    else:
        # --- Path B: K ("arbitrary") / N ("parallel") tiled reduction with an
        # f32 VMEM accumulator -- the weight bank never has to fit VMEM. ------
        K_eff = _round_up(K, 128)
        if K_eff != K:
            # zero columns/rows contribute nothing to the accumulation
            x2d = jnp.pad(x2d, ((0, 0), (0, K_eff - K)))
            w2d = jnp.pad(w2d, ((0, K_eff - K), (0, 0)))

        if block_overrides is not None:
            tm, tk, tn = block_overrides
        else:
            tk = _largest_block(K_eff, 1024)
            tn = _largest_block(N, 1024)
            fixed = 2 * tk * tn * w_b                      # dbuf weight block
            per_row = 2 * tk * lhs_b + 2 * tn * 4 + tn * 4  # LHS + out + acc scratch
            avail = max(cfg["budget"] - fixed, 128 * per_row)
            tm = _pick_tm(M_pad, avail, per_row, cfg)

        cost = pl.CostEstimate(
            flops=2 * M_pad * K_eff * N, transcendentals=0,
            bytes_accessed=(M_pad * K_eff * lhs_b
                            + K_eff * N * w_b * (M_pad // tm)
                            + M_pad * N * 4))

        y = pl.pallas_call(
            _analysis_matmul_kernel_tiled,
            out_shape=jax.ShapeDtypeStruct((M_pad, N), jnp.float32),
            grid=(M_pad // tm, N // tn, K_eff // tk),
            in_specs=[pl.BlockSpec((tm, tk), lambda i, j, k: (i, k)),
                      pl.BlockSpec((tk, tn), lambda i, j, k: (k, j))],
            out_specs=pl.BlockSpec((tm, tn), lambda i, j, k: (i, j)),
            scratch_shapes=[pltpu.VMEM((tm, tn), jnp.float32)],
            compiler_params=pltpu.CompilerParams(
                dimension_semantics=("parallel", "parallel", "arbitrary"), **params),
            cost_estimate=cost,
        )(x2d, w2d)

    return y[:M] if M_pad != M else y


# ----------------------------------------------------------------------------
# Deterministic synthetic NSGT atom banks (Gabor-like), one per jagged bucket.
# ----------------------------------------------------------------------------
def make_bucket_atoms(slice_len, n_bins, n_frames, freq_offset):
    """Returns (w_stacked, w_complex):
       w_stacked : (slice_len, 2*n_bins*n_frames) f32, re/im interleaved
       w_complex : (n_bins*n_frames, slice_len) complex64 (reference)"""
    hop = slice_len // n_frames
    win_len = 2 * hop
    t = np.arange(slice_len, dtype=np.float64)

    atoms = np.zeros((n_bins, n_frames, slice_len), dtype=np.complex64)
    for b in range(n_bins):
        f = freq_offset + b + 1  # cycles per slice
        for m in range(n_frames):
            center = m * hop + hop / 2.0
            u = (t - center) / win_len
            win = np.where(np.abs(u) <= 0.5, 0.5 + 0.5 * np.cos(2 * np.pi * u), 0.0)
            phase = -2.0j * np.pi * f * t / slice_len  # analysis = conjugate atom
            atoms[b, m, :] = (win * np.exp(phase)).astype(np.complex64)

    w_complex = atoms.reshape(n_bins * n_frames, slice_len)
    w_stacked = np.stack([w_complex.real.T, w_complex.imag.T], axis=-1)
    w_stacked = w_stacked.reshape(slice_len, 2 * n_bins * n_frames)
    return jnp.asarray(w_stacked, jnp.float32), jnp.asarray(w_complex, jnp.complex64)


# ----------------------------------------------------------------------------
# NSGT_SL forward (JAX + Pallas).
# ----------------------------------------------------------------------------
class NSGT_SL:
    def __init__(self, nb_timesteps, nb_slices, buckets, use_bf16=False):
        assert nb_timesteps % nb_slices == 0
        self.nb_slices = nb_slices
        self.slice_len = nb_timesteps // nb_slices
        self.buckets = list(buckets)          # list of (n_bins, n_frames)
        self.use_bf16 = use_bf16

        self.atoms = []                       # complex reference atoms per bucket
        self.offsets = []                     # column offset inside the fused RHS
        stacked = []
        off = 0
        for i, (nb, nf) in enumerate(self.buckets):
            w_st, w_cx = make_bucket_atoms(self.slice_len, nb, nf, freq_offset=4 * i)
            stacked.append(w_st)
            self.atoms.append(w_cx)
            self.offsets.append(off)
            off += 2 * nb * nf
        self.n_total = off
        self.n_pad = _round_up(off, 128)      # lane-dense fused output width
        w_fused = jnp.concatenate(stacked, axis=1)
        if self.n_pad != off:
            w_fused = jnp.pad(w_fused, ((0, 0), (0, self.n_pad - off)))
        # use_bf16 affects ONLY the weight dtype; the LHS stays f32 in HBM and
        # is cast to the weight dtype on the VPU inside the kernel.
        dtype = jnp.bfloat16 if use_bf16 else jnp.float32
        self.w_fused = w_fused.astype(dtype)

    def forward(self, x):
        """x: (nb_samples, nb_channels, nb_timesteps) f32
        returns list of (nb_samples, nb_channels, bins_i, nb_slices, frames_i, 2)"""
        nb_samples, nb_channels, nb_timesteps = x.shape
        S, L = self.nb_slices, self.slice_len
        b_flat = nb_samples * nb_channels

        # x.view(-1, T) then cut into S non-overlapping slices of length L
        x_sl = x.reshape(b_flat * S, L)

        # hot path: ALL buckets' complex analysis inner products as ONE matmul
        y = analysis_matmul(x_sl, self.w_fused)                  # (B*S, n_pad) f32

        # TODO(synk): the per-bucket slice->reshape->transpose below re-reads y
        # once (bins<->slices swap is inherent to the row layout); if profiling
        # shows it matters, replace with a follow-up Pallas re-interleave kernel.
        out = []
        for (n_bins, n_frames), off in zip(self.buckets, self.offsets):
            n_i = 2 * n_bins * n_frames
            yi = y[:, off:off + n_i]
            yi = yi.reshape(b_flat, S, n_bins, n_frames, 2)      # re/im pairs
            # mirror torch: moveaxis(slices, 0, -2), view_as_real, then view
            yi = jnp.transpose(yi, (0, 2, 1, 3, 4))              # (B, bins, S, frames, 2)
            yi = yi.reshape(nb_samples, nb_channels, n_bins, S, n_frames, 2)
            out.append(yi)
        return out

    def forward_reference(self, x):
        """Pure-JAX reference mirroring the PyTorch semantics exactly."""
        nb_samples, nb_channels, nb_timesteps = x.shape
        S, L = self.nb_slices, self.slice_len
        b_flat = nb_samples * nb_channels
        x_sl = x.reshape(b_flat, S, L).astype(jnp.complex64)

        out = []
        for (n_bins, n_frames), atoms in zip(self.buckets, self.atoms):
            a = atoms.reshape(n_bins, n_frames, L)
            # C[i]: complex (S, B_flat, bins, frames)  -- slices lead (axis 0)
            c = jnp.einsum("bsl,kml->sbkm", x_sl, a,
                           precision=jax.lax.Precision.HIGHEST)
            # torch.moveaxis(c, 0, -2): (B_flat, bins, S, frames)
            c = jnp.moveaxis(c, 0, -2)
            # view_as_real: (..., 2), then view(shape[:-1] + last 4 dims)
            c = jnp.stack([c.real, c.imag], axis=-1)
            c = c.reshape(nb_samples, nb_channels, n_bins, S, n_frames, 2)
            out.append(c)
        return out


if __name__ == "__main__":
    # Small but TPU-meaningful shapes:
    #   M = nb_samples*nb_channels*nb_slices = 256  -> two row tiles of 128
    #   K = slice_len = 256, fused N = 88 -> padded to 128 (lane dense)
    nb_samples, nb_channels = 2, 2
    nb_slices, slice_len = 64, 256
    nb_timesteps = nb_slices * slice_len            # 16384
    buckets = [(3, 8), (5, 4)]                      # jagged (nb_bins_1, nb_frames)

    key = jax.random.PRNGKey(0)
    x = jax.random.normal(key, (nb_samples, nb_channels, nb_timesteps),
                          dtype=jnp.float32)

    # f32 path: tight check against the complex einsum reference
    model = NSGT_SL(nb_timesteps, nb_slices, buckets)
    C = [jax.block_until_ready(c) for c in model.forward(x)]
    C_ref = model.forward_reference(x)
    for c, cr in zip(C, C_ref):
        assert c.shape == cr.shape, (c.shape, cr.shape)
        np.testing.assert_allclose(np.asarray(c), np.asarray(cr),
                                   rtol=2e-4, atol=5e-4)

    # bf16 atoms (f32 LHS cast to bf16 in-kernel, f32 MXU accumulation)
    model_bf16 = NSGT_SL(nb_timesteps, nb_slices, buckets, use_bf16=True)
    C_bf = [jax.block_until_ready(c) for c in model_bf16.forward(x)]
    for c, cr in zip(C_bf, C_ref):
        ref = np.asarray(cr)
        err = np.linalg.norm(np.asarray(c) - ref) / np.linalg.norm(ref)
        assert err < 2e-2, f"bf16 relative error too large: {err}"

    # Exercise the K/N-tiled accumulator path (used for large atom banks) and
    # the <=127-row pad path so both compile & run on this generation.
    x_sl = x.reshape(-1, model.slice_len)
    y_res = jax.block_until_ready(analysis_matmul(x_sl, model.w_fused))
    y_tiled = jax.block_until_ready(
        analysis_matmul(x_sl, model.w_fused, force_tiled=True,
                        block_overrides=(128, 128, 128)))
    np.testing.assert_allclose(np.asarray(y_tiled), np.asarray(y_res),
                               rtol=5e-4, atol=1e-3)
    y_tail = jax.block_until_ready(analysis_matmul(x_sl[:200], model.w_fused))
    np.testing.assert_allclose(np.asarray(y_tail), np.asarray(y_res)[:200],
                               rtol=1e-5, atol=1e-5)

    print("KERNEL_OK")
</pallas_src>

<mosaic_0001>
module attributes {stable_mosaic.version = 11 : i64} {
  func.func @_probe_kernel(%arg0: i32, %arg1: memref<8x128xf32, #tpu.memory_space<vmem>>, %arg2: memref<8x128xf32, #tpu.memory_space<vmem>>, %arg3: memref<8x128xf32, #tpu.memory_space<vmem>>) attributes {dimension_semantics = [#tpu.dimension_semantics<arbitrary>], iteration_bounds = array<i64: 2>, scalar_prefetch = 0 : i64, scratch_operands = 0 : i64, tpu.core_type = #tpu.core_type<tc>, window_params = [{transform_indices = @transform_0, window_bounds = array<i64: 8, 128>}, {pipeline_mode = #tpu.pipeline_mode<synchronous>, transform_indices = @transform_1, window_bounds = array<i64: 8, 128>}, {transform_indices = @transform_2, window_bounds = array<i64: 8, 128>}]} {
    %c0 = arith.constant 0 : index
    %c0_0 = arith.constant 0 : index
    %0 = vector.load %arg1[%c0, %c0_0] : memref<8x128xf32, #tpu.memory_space<vmem>>, vector<8x128xf32>
    %c0_1 = arith.constant 0 : index
    %c0_2 = arith.constant 0 : index
    %1 = vector.load %arg2[%c0_1, %c0_2] : memref<8x128xf32, #tpu.memory_space<vmem>>, vector<8x128xf32>
    %2 = arith.addf %0, %1 : vector<8x128xf32>
    %c0_3 = arith.constant 0 : index
    %c0_4 = arith.constant 0 : index
    %3 = vector.load %arg3[%c0_3, %c0_4] : memref<8x128xf32, #tpu.memory_space<vmem>>, vector<8x128xf32>
    tpu.vector_store %arg3[%c0_3, %c0_4], %2 {strides = array<i32>} : memref<8x128xf32, #tpu.memory_space<vmem>>, vector<8x128xf32>,
    return
  }
  func.func @transform_0(%arg0: i32) -> (i32, i32) {
    %c0_i32 = arith.constant 0 : i32
    %c0_i32_0 = arith.constant 0 : i32
    return %arg0, %c0_i32 : i32, i32
  }
  func.func @transform_1(%arg0: i32) -> (i32, i32) {
    %c0_i32 = arith.constant 0 : i32
    %c0_i32_0 = arith.constant 0 : i32
    %c0_i32_1 = arith.constant 0 : i32
    return %c0_i32, %c0_i32_0 : i32, i32
  }
  func.func @transform_2(%arg0: i32) -> (i32, i32) {
    %c0_i32 = arith.constant 0 : i32
    %c0_i32_0 = arith.constant 0 : i32
    return %arg0, %c0_i32 : i32, i32
  }
}

module attributes {stable_mosaic.version = 11 : i64} {
  func.func @_analysis_matmul_kernel(%arg0: i32, %arg1: memref<128x256xf32, #tpu.memory_space<vmem>>, %arg2: memref<256x128xf32, #tpu.memory_space<vmem>>, %arg3: memref<128x128xf32, #tpu.memory_space<vmem>>) attributes {dimension_semantics = [#tpu.dimension_semantics<parallel>], iteration_bounds = array<i64: 2>, scalar_prefetch = 0 : i64, scratch_operands = 0 : i64, tpu.core_type = #tpu.core_type<tc>, window_params = [{transform_indices = @transform_0, window_bounds = array<i64: 128, 256>}, {pipeline_mode = #tpu.pipeline_mode<synchronous>, transform_indices = @transform_1, window_bounds = array<i64: 256, 128>}, {transform_indices = @transform_2, window_bounds = array<i64: 128, 128>}]} {
    %c0 = arith.constant 0 : index
    %c0_0 = arith.constant 0 : index
    %0 = vector.load %arg1[%c0, %c0_0] : memref<128x256xf32, #tpu.memory_space<vmem>>, vector<128x256xf32>
    %c0_1 = arith.constant 0 : index
    %c0_2 = arith.constant 0 : index
    %1 = vector.load %arg2[%c0_1, %c0_2] : memref<256x128xf32, #tpu.memory_space<vmem>>, vector<256x128xf32>
    %cst = arith.constant dense<0.000000e+00> : vector<128x128xf32>
    %2 = tpu.matmul %0, %1, %cst {dimension_numbers = #tpu.dot_dimension_numbers<[1], [0], [0], [1], [0, 0, 1, 1], [], []>} : vector<128x256xf32>, vector<256x128xf32>, vector<128x128xf32> -> vector<128x128xf32>
    %c0_3 = arith.constant 0 : index
    %c0_4 = arith.constant 0 : index
    %3 = vector.load %arg3[%c0_3, %c0_4] : memref<128x128xf32, #tpu.memory_space<vmem>>, vector<128x128xf32>
    tpu.vector_store %arg3[%c0_3, %c0_4], %2 {strides = array<i32>} : memref<128x128xf32, #tpu.memory_space<vmem>>, vector<128x128xf32>,
    return
  }
  func.func @transform_0(%arg0: i32) -> (i32, i32) {
    %c0_i32 = arith.constant 0 : i32
    %c0_i32_0 = arith.constant 0 : i32
    return %arg0, %c0_i32 : i32, i32
  }
  func.func @transform_1(%arg0: i32) -> (i32, i32) {
    %c0_i32 = arith.constant 0 : i32
    %c0_i32_0 = arith.constant 0 : i32
    %c0_i32_1 = arith.constant 0 : i32
    return %c0_i32, %c0_i32_0 : i32, i32
  }
  func.func @transform_2(%arg0: i32) -> (i32, i32) {
    %c0_i32 = arith.constant 0 : i32
    %c0_i32_0 = arith.constant 0 : i32
    return %arg0, %c0_i32 : i32, i32
  }
}

</mosaic_0001>

<bundles_post_ra>
// kernel: tpu_custom_call.1
= control target key start
LH: loop header
LB: loop body
LE: loop exit
PB: predicated region body
PF: predicated region fallthrough
CT: control target
= control target key end

     0   :  { %7 = vsyncpa [#allocation3], 0  ;;  %s690_s0 = inlined_call_operand.hbm [shape: f32[16,128], index: 0, kind: input, shape index: {}]   ;;  %s691_s1 = inlined_call_operand.hbm [shape: f32[8,128], index: 1, kind: input, shape index: {}]   ;;  %s692_s2 = inlined_call_operand.hbm [shape: f32[16,128], index: 2, kind: output, shape index: {}]  }
   0x1   :  { %9 = vsyncpa [#allocation3 + $0x1], 0 }
   0x2   :  { %10 = vsyncpa [#allocation6], 0 }
   0x3   :  { %11 = vsyncpa [#allocation4], 0 }
   0x4   :  { %13 = vsyncpa [#allocation4 + $0x1], 0  ;;  %s489_s9 = smov 0   ;;  %s491_s10 = smov 0  }
   0x5   :  { %s493_s11 = smov 0   ;;  %s495_s12 = smov 0  }
   0x6 LB: > { %s510_s13 = sadd.s32 4294967295, %s469_s12   ;;  %s270_s14 = sadd.s32 4294967294, %s469_s12   ;;  %s469_s12 = sphi %s495_s12, %s716_s12   ;;  %s465_s11 = sphi %s493_s11, %s715_s11   ;;  %s461_s10 = sphi %s491_s10, %s714_s10   ;;  %s457_s9 = sphi %s489_s9, %s713_s9  }
   0x7   : > { %p39_p0 = scmp.ne.s32.totalorder %s461_s10, %s457_s9  ;;  %p693_p1 = scmp.eq.s32.totalorder %s510_s13, 0 }
   0x8   : > { %p90_p3 = scmp.eq.s32.totalorder %s270_s14, 1  ;;  %p271_p5 = scmp.ge.s32.totalorder %s469_s12, 1 }
   0x9   : > { %p519_p4 = por %p693_p1, %p39_p0  ;;  %p97_p7 = scmp.lt.s32.totalorder %s469_s12, 3 }
   0xa   : > { %p524_p6 = por %p90_p3, %p39_p0  ;;  %s471_s18 = smov [#allocation5]  }
   0xb   : > { %s696_s15 = scalar_select %p519_p4, 1, 0 }
   0xc   : > { %s697_s16 = scalar_select %p524_p6, 1, 0 }
   0xd   : > { %p529_p8 = pnand %p271_p5, %p97_p7  ;;  %s110_s19 = sshll.u32 %s471_s18, 4  ;;  %s111_s19 = int_to_ptr.vmem [resolvable:$true] %s110_s19 }
   0xe   : > { %s537_s20 = sadd.s32 1, %s469_s12   ;;  %s26_s24 = sadd.s32 1, %s465_s11 }
   0xf   : > { %s698_s17 = scalar_select %p529_p8, 1, 0 }
  0x10   : > { %p292_p10 = pneg %p529_p8  ;;  %s23_s22 = ssub.s32 %s469_s12, %s537_s20 }
  0x11   : > { %p547_p12 = scmp.eq.s32.totalorder %s23_s22, 0  ;;  %s341_s27 = scalar_lea.hbm %s691_s1, 128 }
  0x12   : > { %p541_p11 = pnand %p292_p10, %p693_p1  ;;  %p342_p0 = scmp.ne.s32.totalorder %s691_s1, %s341_s27 }
  0x13   : > { %s700_s23 = scalar_select %p547_p12, 1, 0 }
  0x14   : > { %p343_p3 = pneg %p541_p11  ;;  %p348_p10 = scmp.lt.u32.totalorder %s341_s27, %s691_s1 }
  0x16   : > { %p344_p5 = pnand %p343_p3, %p342_p0 }
  0x18   : > { %p345_p7 = pneg %p344_p5 }
  0x1a   : > { %p350_p9 = pnand %p348_p10, %p345_p7 }
  0x1c   : > { %353 = shalt.err (!%p350_p9)
}
  0x1d   : > { %s354_s4 = scalar_lea.vmem %s111_s19, 128  ;;  %p362_p6 = scmp.lt.s32.totalorder %s111_s19, %s111_s19 }
  0x1e   : > { %p355_p1 = scmp.ne.s32.totalorder %s111_s19, %s354_s4  ;;  %p363_p4 = scmp.lt.s32.totalorder %s354_s4, %s354_s4 }
  0x20   : > { %p357_p2 = pnand %p355_p1, %p343_p3  ;;  %p364_p8 = por %p363_p4, %p362_p6 }
  0x22   : > { %p358_p13 = pneg %p357_p2 }
  0x24   : > { %p365_p12 = pnand %p364_p8, %p358_p13 }
  0x26   : > { %368 = shalt.err (!%p365_p12)
}
  0x27   : > { %295 = dma.hbm_to_vmem [thread:$0]  (!%p541_p11), %s691_s1, 128, %s111_s19, [#allocation6]  }
  0x28   : > { %p701_p1 = scmp.ne.s32.totalorder %s700_s23, 0  ;;  %p34_p2 = scmp.eq.s32.totalorder %s469_s12, 0 }
  0x29   : > { %p702_p4 = scmp.ne.s32.totalorder %s465_s11, %s461_s10  ;;  %p703_p6 = scmp.eq.s32.totalorder %s510_s13, 1 }
  0x2a   : > { %s573_s7 = scalar_select %p701_p1, %s465_s11, %s26_s24  }
  0x2b   : > { %p581_p8 = por %p703_p6, %p702_p4  ;;  %p305_p9 = scmp.lt.s32.totalorder %s469_s12, 2 }
  0x2c   : > { %s121_s14 = sand.u32 1, %s465_s11   ;;  %p705_p12 = pmov %p702_p4 }
  0x2d   : > { %s274_s18 = sshll.u32 %s121_s14, 3  ;;  %s275_s21 = sshll.u32 %s469_s12, 7 }
  0x2e   : > { %p35_p13 = por %p34_p2, %p705_p12  ;;  %s594_s19 = scalar_lea.hbm %s690_s0, %s275_s21 }
  0x2f   : > { %s125_s23 = scalar_lea.vmem [#allocation2], %s274_s18  ;;  %s122_s27 = scalar_lea.sflag [#allocation3], %s121_s14 }
  0x30   : > { %s132_s24 = sshll.u32 %s125_s23, 4  ;;  %p596_p11 = pnand %p305_p9, %p35_p13  ;;  %s600_s24 = int_to_ptr.vmem [resolvable:$true] %s132_s24 }
  0x31   : > { %s369_s28 = scalar_lea.hbm %s594_s19, 128  ;;  %s374_s3 = scalar_lea.hbm %s690_s0, 256 }
  0x32   : > { %p370_p0 = scmp.ne.s32.totalorder %s594_s19, %s369_s28  ;;  %p371_p3 = pneg %p596_p11 }
  0x33   : > { %p375_p10 = scmp.lt.u32.totalorder %s594_s19, %s690_s0  ;;  %p376_p1 = scmp.lt.u32.totalorder %s374_s3, %s369_s28 }
  0x34   : > { %p372_p5 = pnand %p371_p3, %p370_p0  ;;  %p378_p4 = scmp.lt.u32.totalorder %s369_s28, %s594_s19 }
  0x35   : > { %p377_p2 = por %p376_p1, %p375_p10 }
  0x36   : > { %p373_p7 = pneg %p372_p5 }
  0x37   : > { %p379_p6 = por %p378_p4, %p377_p2 }
  0x39   : > { %p380_p9 = pnand %p379_p6, %p373_p7 }
  0x3b   : > { %383 = shalt.err (!%p380_p9)
}
  0x3c   : > { %s384_s6 = scalar_lea.vmem %s600_s24, 128  ;;  %s472_s14 = smov [#allocation2]  }
  0x3d   : > { %p385_p12 = scmp.ne.s32.totalorder %s600_s24, %s384_s6  ;;  %s389_s18 = sshll.u32 %s472_s14, 4  ;;  %s390_s18 = int_to_ptr.vmem [resolvable:$false] %s389_s18 }
  0x3e   : > { %s391_s21 = scalar_lea.vmem %s390_s18, 256  ;;  %p392_p5 = scmp.lt.s32.totalorder %s600_s24, %s390_s18 }
  0x3f   : > { %p387_p13 = pnand %p385_p12, %p371_p3  ;;  %p393_p10 = scmp.lt.s32.totalorder %s391_s21, %s384_s6 }
  0x41   : > { %p388_p0 = pneg %p387_p13  ;;  %p394_p1 = por %p393_p10, %p392_p5 }
  0x43   : > { %p395_p2 = pnand %p394_p1, %p388_p0 }
  0x45   : > { %398 = shalt.err (!%p395_p2)
}
  0x46   : > { %299 = dma.hbm_to_vmem [thread:$0]  (!%p596_p11), %s594_s19, 128, %s600_s24, %s122_s27  }
  0x47   : > { %p707_p7 = scmp.ne.s32.totalorder %s698_s17, 0 }
  0x48   : > { %s630_s22 = sand.u32 (!%p707_p7), 1, %s461_s10   ;;  %p708_p3 = scmp.ne.s32.totalorder (!%p707_p7), %s696_s15, 0 }
  0x49   : > { %141 = sbr.rel (%p707_p7) target bundleno = 109 (0x6d), region = 28  ;;  %s277_s25 = sshll.u32 (!%p707_p7), %s630_s22, 3 }
  0x4a   : > { %s144_s23 = scalar_lea.sflag (!%p707_p7), [#allocation3], %s630_s22  ;;  %s147_s28 = scalar_lea.vmem (!%p707_p7), [#allocation2], %s277_s25 }
  0x50   : > { %444 = dma.done.wait (%p708_p3), %s144_s23, 128  }
  0x51   : > { %446 = vsyncadd (%p708_p3), %s144_s23, 4294967168  ;;  %p709_p4 = scmp.eq.s32.totalorder %s510_s13, 0 }
  0x53   : > { %448 = dma.done.wait (%p709_p4), [#allocation6], 128   ;;  %p710_p11 = pmov %p709_p4 }
  0x54   : > { %s171_s17 = scalar_lea.vmem [#allocation7], %s277_s25  ;;  %s281_s24 = sshll.u32 %s510_s13, 7  ;;  %v172_v0 = vld [vmem:[%s147_s28] sm:$0xff]  ;;  %v173_v1 = vld [vmem:[#allocation5] sm:$0xff] }
  0x55   : > { %450 = vsyncadd (%p710_p11), [#allocation6], 4294967168  ;;  %s190_s19 = sshll.u32 %s171_s17, 4  ;;  %v174_v2 = vadd.f32 %v173_v1, %v172_v0  ;;  %s648_s27 = scalar_lea.hbm %s692_s2, %s281_s24  ;;  %s643_s19 = int_to_ptr.vmem [resolvable:$true] %s190_s19 }
  0x56   : > { %s177_s29 = scalar_lea.sflag [#allocation4], %s630_s22  ;;  %s399_s30 = scalar_lea.vmem %s643_s19, 128 }
  0x57   : > { %175 = vst [vmem:[%s171_s17] sm:$0xff] %v174_v2  ;;  %p400_p6 = scmp.ne.s32.totalorder %s643_s19, %s399_s30  ;;  %s473_s13 = smov [#allocation7]  }
  0x58   : > { %s403_s3 = sshll.u32 %s473_s13, 4  ;;  %s404_s3 = int_to_ptr.vmem [resolvable:$false] %s403_s3 }
  0x59   : > { %p401_p9 = pnand %p400_p6, %p581_p8  ;;  %s405_s4 = scalar_lea.vmem %s404_s3, 256 }
  0x5a   : > { %p406_p13 = scmp.lt.s32.totalorder %s643_s19, %s404_s3  ;;  %p407_p0 = scmp.lt.s32.totalorder %s405_s4, %s399_s30 }
  0x5b   : > { %p402_p12 = pneg %p401_p9 }
  0x5c   : > { %p408_p5 = por %p407_p0, %p406_p13 }
  0x5e   : > { %p409_p10 = pnand %p408_p5, %p402_p12 }
  0x60   : > { %412 = shalt.err (!%p409_p10)
}
  0x61   : > { %s413_s5 = scalar_lea.hbm %s648_s27, 128  ;;  %s417_s18 = scalar_lea.hbm %s692_s2, 256 }
  0x62   : > { %p414_p1 = scmp.ne.s32.totalorder %s648_s27, %s413_s5  ;;  %p418_p3 = scmp.lt.u32.totalorder %s648_s27, %s692_s2 }
  0x63   : > { %p419_p4 = scmp.lt.u32.totalorder %s417_s18, %s413_s5  ;;  %p421_p6 = scmp.lt.u32.totalorder %s413_s5, %s648_s27 }
  0x64   : > { %p415_p2 = pnand %p414_p1, %p581_p8 }
  0x65   : > { %p420_p11 = por %p419_p4, %p418_p3 }
  0x66   : > { %p416_p7 = pneg %p415_p2 }
  0x67   : > { %p422_p9 = por %p421_p6, %p420_p11 }
  0x69   : > { %p423_p12 = pnand %p422_p9, %p416_p7 }
  0x6b   : > { %426 = shalt.err (!%p423_p12)
}
  0x6c   : > { %290 = dma.vmem_to_hbm [thread:$0]  (%p581_p8), %s643_s19, 128, %s648_s27, %s177_s29  }
  0x6d PF: > { %s202_s25 = sand.u32 1, %s457_s9   ;;  %p711_p13 = scmp.ne.s32.totalorder %s697_s16, 0 }
  0x6e   : > { %p712_p0 = scmp.ge.s32.totalorder %s469_s12, 2  ;;  %s203_s23 = scalar_lea.sflag [#allocation4], %s202_s25 }
  0x70   : > { %p301_p5 = pnand %p712_p0, %p711_p13 }
  0x72   : > { %452 = dma.done.wait (!%p301_p5), %s203_s23, 128  }
  0x73   : > { %454 = vsyncadd (!%p301_p5), %s203_s23, 4294967168  ;;  %p16_p10 = scmp.ge.s32.totalorder %s537_s20, 4   ;;  %s713_s9 = smov %s461_s10 }
  0x74   : > { %s714_s10 = smov %s465_s11  ;;  %s715_s11 = smov %s573_s7 }
  0x75   : > { %s716_s12 = smov %s537_s20  ;;  %18 = sbr.rel (!%p16_p10) target bundleno = 6 (0x6), region = 77 }
  0x7c   :  { %208 = vsyncpa [#allocation3], 1 }
  0x7d   :  { %210 = vsyncpa [#allocation3 + $0x1], 1 }
  0x7e   :  { %211 = vsyncpa [#allocation6], 1 }
  0x7f   :  { %212 = vsyncpa [#allocation4], 1 }
  0x80   :  { %214 = vsyncpa [#allocation4 + $0x1], 1 }

// kernel: tpu_custom_call.1
= control target key start
LH: loop header
LB: loop body
LE: loop exit
PB: predicated region body
PF: predicated region fallthrough
CT: control target
= control target key end

     0   :  { %7 = vsyncpa [#allocation3], 0  ;;  %s1122_s0 = inlined_call_operand.hbm [shape: f32[256,256], index: 0, kind: input, shape index: {}]   ;;  %s1123_s1 = inlined_call_operand.hbm [shape: f32[256,128], index: 1, kind: input, shape index: {}]   ;;  %s1124_s2 = inlined_call_operand.hbm [shape: f32[256,128], index: 2, kind: output, shape index: {}]  }
   0x1   :  { %9 = vsyncpa [#allocation3 + $0x1], 0 }
   0x2   :  { %10 = vsyncpa [#allocation6], 0 }
   0x3   :  { %11 = vsyncpa [#allocation4], 0 }
   0x4   :  { %13 = vsyncpa [#allocation4 + $0x1], 0  ;;  %s867_s9 = smov 0   ;;  %s869_s10 = smov 0  }
   0x5   :  { %s871_s11 = smov 0   ;;  %s873_s12 = smov 0  }
   0x6 LB: > { %s888_s13 = sadd.s32 4294967295, %s841_s12   ;;  %s502_s14 = sadd.s32 4294967294, %s841_s12   ;;  %s841_s12 = sphi %s873_s12, %s1144_s12   ;;  %s837_s11 = sphi %s871_s11, %s1143_s11   ;;  %s833_s10 = sphi %s869_s10, %s1142_s10   ;;  %s829_s9 = sphi %s867_s9, %s1141_s9  }
   0x7   : > { %p39_p0 = scmp.ne.s32.totalorder %s833_s10, %s829_s9  ;;  %p1125_p1 = scmp.eq.s32.totalorder %s888_s13, 0 }
   0x8   : > { %p90_p3 = scmp.eq.s32.totalorder %s502_s14, 1  ;;  %p503_p5 = scmp.ge.s32.totalorder %s841_s12, 1 }
   0x9   : > { %p897_p4 = por %p1125_p1, %p39_p0  ;;  %p97_p7 = scmp.lt.s32.totalorder %s841_s12, 3 }
   0xa   : > { %p902_p6 = por %p90_p3, %p39_p0  ;;  %s843_s18 = smov [#allocation5]  }
   0xb   : > { %s1128_s15 = scalar_select %p897_p4, 1, 0 }
   0xc   : > { %s1129_s16 = scalar_select %p902_p6, 1, 0 }
   0xd   : > { %p907_p8 = pnand %p503_p5, %p97_p7  ;;  %s109_s19 = sshll.u32 %s843_s18, 4  ;;  %s911_s19 = int_to_ptr.vmem [resolvable:$true] %s109_s19 }
   0xe   : > { %s923_s21 = sadd.s32 1, %s841_s12   ;;  %s26_s22 = sadd.s32 1, %s837_s11 }
   0xf   : > { %s1130_s17 = scalar_select %p907_p8, 1, 0 }
  0x10   : > { %p658_p9 = pneg %p907_p8  ;;  %s23_s23 = ssub.s32 %s841_s12, %s923_s21 }
  0x11   : > { %s713_s26 = scalar_lea.hbm %s1123_s1, 4096 }
  0x12   : > { %p918_p11 = pnand %p658_p9, %p1125_p1  ;;  %p714_p12 = scmp.ne.s32.totalorder %s1123_s1, %s713_s26 }
  0x13   : > { %p720_p5 = scmp.lt.u32.totalorder %s713_s26, %s1123_s1 }
  0x14   : > { %p715_p13 = pneg %p918_p11 }
  0x16   : > { %p716_p0 = pnand %p715_p13, %p714_p12 }
  0x18   : > { %p717_p3 = pneg %p716_p0 }
  0x1a   : > { %p722_p7 = pnand %p720_p5, %p717_p3 }
  0x1c   : > { %725 = shalt.err (!%p722_p7)
}
  0x1d   : > { %s726_s3 = scalar_lea.vmem %s911_s19, 4096  ;;  %p734_p2 = scmp.lt.s32.totalorder %s911_s19, %s911_s19 }
  0x1e   : > { %p727_p9 = scmp.ne.s32.totalorder %s911_s19, %s726_s3  ;;  %p735_p6 = scmp.lt.s32.totalorder %s726_s3, %s726_s3 }
  0x20   : > { %p729_p10 = pnand %p727_p9, %p715_p13  ;;  %p736_p4 = por %p735_p6, %p734_p2 }
  0x22   : > { %p730_p1 = pneg %p729_p10 }
  0x24   : > { %p737_p8 = pnand %p736_p4, %p730_p1 }
  0x26   : > { %740 = shalt.err (!%p737_p8)
}
  0x27   : > { %s844_s4 = smov 128   ;;  %s845_s5 = smov 8  }
  0x28   : > { %661 = dma.hbm_to_vmem [thread:$0]  (!%p918_p11), %s1123_s1, 4096, %s911_s19, [#allocation6], %s844_s4, %s844_s4, %s845_s5  }
  0x29   : > { %p24_p2 = scmp.eq.s32.totalorder %s23_s23, 0  ;;  %p33_p1 = scmp.ne.s32.totalorder %s837_s11, %s833_s10 }
  0x2a   : > { %p34_p4 = scmp.eq.s32.totalorder %s841_s12, 0  ;;  %p671_p6 = scmp.lt.s32.totalorder %s841_s12, 2 }
  0x2b   : > { %s954_s8 = scalar_select %p24_p2, %s837_s11, %s26_s22  }
  0x2c   : > { %p35_p8 = por %p34_p4, %p33_p1  ;;  %p1132_p10 = scmp.eq.s32.totalorder %s888_s13, 1 }
  0x2d   : > { %s123_s18 = sand.u32 1, %s837_s11   ;;  %s520_s24 = sshll.u32 %s841_s12, 12 }
  0x2e   : > { %p958_p12 = por %p1132_p10, %p33_p1  ;;  %s506_s25 = sshll.u32 %s123_s18, 8 }
  0x2f   : > { %s967_s27 = scalar_lea.hbm %s1122_s0, %s520_s24  ;;  %s127_s19 = scalar_lea.vmem [#allocation2], %s506_s25 }
  0x30   : > { %s135_s22 = sshll.u32 %s127_s19, 4  ;;  %p969_p11 = pnand %p671_p6, %p35_p8  ;;  %s973_s22 = int_to_ptr.vmem [resolvable:$true] %s135_s22 }
  0x31   : > { %s975_s28 = scalar_lea.sflag [#allocation3], %s123_s18  ;;  %s741_s29 = scalar_lea.hbm %s967_s27, 4096 }
  0x32   : > { %p742_p13 = scmp.ne.s32.totalorder %s967_s27, %s741_s29  ;;  %p743_p0 = pneg %p969_p11 }
  0x33   : > { %s746_s4 = scalar_lea.hbm %s1122_s0, 8192  ;;  %p747_p7 = scmp.lt.u32.totalorder %s967_s27, %s1122_s0 }
  0x34   : > { %p744_p3 = pnand %p743_p0, %p742_p13  ;;  %p748_p9 = scmp.lt.u32.totalorder %s746_s4, %s741_s29 }
  0x35   : > { %p750_p1 = scmp.lt.u32.totalorder %s741_s29, %s967_s27 }
  0x36   : > { %p745_p5 = pneg %p744_p3  ;;  %p749_p2 = por %p748_p9, %p747_p7 }
  0x38   : > { %p751_p4 = por %p750_p1, %p749_p2 }
  0x3a   : > { %p752_p6 = pnand %p751_p4, %p745_p5 }
  0x3c   : > { %755 = shalt.err (!%p752_p6)
}
  0x3d   : > { %s756_s7 = scalar_lea.vmem %s973_s22, 4096  ;;  %s846_s18 = smov [#allocation2]  }
  0x3e   : > { %p757_p8 = scmp.ne.s32.totalorder %s973_s22, %s756_s7  ;;  %s761_s24 = sshll.u32 %s846_s18, 4  ;;  %s762_s24 = int_to_ptr.vmem [resolvable:$false] %s761_s24 }
  0x3f   : > { %s763_s25 = scalar_lea.vmem %s762_s24, 8192  ;;  %p764_p3 = scmp.lt.s32.totalorder %s973_s22, %s762_s24 }
  0x40   : > { %p759_p10 = pnand %p757_p8, %p743_p0  ;;  %p765_p7 = scmp.lt.s32.totalorder %s763_s25, %s756_s7 }
  0x42   : > { %p760_p13 = pneg %p759_p10  ;;  %p766_p9 = por %p765_p7, %p764_p3 }
  0x44   : > { %p767_p2 = pnand %p766_p9, %p760_p13 }
  0x46   : > { %770 = shalt.err (!%p767_p2)
}
  0x47   : > { %s847_s20 = smov 256   ;;  %s848_s26 = smov 16  }
  0x48   : > { %665 = dma.hbm_to_vmem [thread:$0]  (!%p969_p11), %s967_s27, 4096, %s973_s22, %s975_s28, %s847_s20, %s847_s20, %s848_s26  }
  0x49   : > { %p1135_p0 = scmp.ne.s32.totalorder %s1130_s17, 0 }
  0x4a   : > { %s1006_s19 = sand.u32 (!%p1135_p0), 1, %s833_s10   ;;  %p1136_p5 = scmp.ne.s32.totalorder (!%p1135_p0), %s1128_s15, 0 }
  0x4b   : > { %147 = sbr.rel (%p1135_p0) target bundleno = 379 (0x17b), region = 28  ;;  %s511_s29 = sshll.u32 (!%p1135_p0), %s1006_s19, 8 }
  0x4c   : > { %s150_s30 = scalar_lea.sflag (!%p1135_p0), [#allocation3], %s1006_s19  ;;  %s1010_s3 = scalar_lea.vmem (!%p1135_p0), [#allocation2], %s511_s29 }
  0x52   : > { %816 = dma.done.wait (%p1136_p5), %s150_s30, 4096  }
  0x53   : > { %818 = vsyncadd (%p1136_p5), %s150_s30, 4294963200  ;;  %p1137_p11 = scmp.eq.s32.totalorder %s888_s13, 0 }
  0x55   : > { %820 = dma.done.wait (%p1137_p11), [#allocation6], 4096   ;;  %p1138_p1 = pmov %p1137_p11 }
  0x56   : > { %v228_v0 = vld [vmem:[#allocation5 + $0x80] sm:$0xff]  ;;  %v229_v1 = vld [vmem:[#allocation5 + $0x88] sm:$0xff]  ;;  %v230_v5 = vld [vmem:[#allocation5 + $0x90] sm:$0xff]  ;;  %s513_s15 = sshll.u32 %s1006_s19, 7  ;;  %s521_s27 = sshll.u32 %s888_s13, 11 }
  0x57   : > { %822 = vsyncadd (%p1138_p1), [#allocation6], 4294963200  ;;  %v212_v2 = vld [vmem:[#allocation5] sm:$0xff]  ;;  %v602_v3 = vpack.c.bf16 %v229_v1, %v228_v0  ;;  %v213_v4 = vld [vmem:[#allocation5 + $0x8] sm:$0xff]  ;;  %s1053_s17 = scalar_lea.vmem [#allocation7], %s513_s15  ;;  %s1074_s4 = scalar_lea.hbm %s1124_s2, %s521_s27 }
  0x58   : > { %v231_v6 = vld [vmem:[#allocation5 + $0x98] sm:$0xff]  ;;  %v604_v7 = vpack.c.bf16 %v213_v4, %v212_v2  ;;  %v214_v9 = vld [vmem:[#allocation5 + $0x10] sm:$0xff]  ;;  %v232_v11 = vld [vmem:[#allocation5 + $0xa0] sm:$0xff]  ;;  %s419_s22 = sshll.u32 %s1053_s17, 4  ;;  %s406_s13 = scalar_lea.sflag [#allocation4], %s1006_s19  ;;  %s1076_s22 = int_to_ptr.vmem [resolvable:$true] %s419_s22 }
  0x59   : > { %v606_v8 = vpack.c.bf16 %v231_v6, %v230_v5  ;;  %v215_v10 = vld [vmem:[#allocation5 + $0x18] sm:$0xff]  ;;  %603 = vmatprep.subr.bf16.mxu0 %v602_v3  ;;  %634 = vmatprep.subr.bf16.mxu1 %v602_v3  ;;  %v233_v12 = vld [vmem:[#allocation5 + $0xa8] sm:$0xff]  ;;  %v216_v15 = vld [vmem:[#allocation5 + $0x20] sm:$0xff]  ;;  %s771_s5 = scalar_lea.vmem %s1076_s22, 2048  ;;  %s849_s6 = smov [#allocation7]  }
  0x5a   : > { %605 = vmatpush3.bf16.msra.mxu0 %v604_v7  ;;  %642 = vmatpush3.bf16.msra.mxu1 %v604_v7  ;;  %v608_v13 = vpack.c.bf16 %v215_v10, %v214_v9  ;;  %v610_v14 = vpack.c.bf16 %v233_v12, %v232_v11  ;;  %v217_v16 = vld [vmem:[#allocation5 + $0x28] sm:$0xff]  ;;  %v234_v17 = vld [vmem:[#allocation5 + $0xb0] sm:$0xff]  ;;  %v235_v18 = vld [vmem:[#allocation5 + $0xb8] sm:$0xff]  ;;  %p772_p4 = scmp.ne.s32.totalorder %s1076_s22, %s771_s5  ;;  %s775_s7 = sshll.u32 %s849_s6, 4  ;;  %s776_s7 = int_to_ptr.vmem [resolvable:$false] %s775_s7 }
  0x5b   : > { %607 = vmatprep.subr.bf16.mxu0 %v606_v8  ;;  %635 = vmatprep.subr.bf16.mxu1 %v606_v8  ;;  %v612_v19 = vpack.c.bf16 %v217_v16, %v216_v15  ;;  %v614_v20 = vpack.c.bf16 %v235_v18, %v234_v17  ;;  %v218_v21 = vld [vmem:[#allocation5 + $0x30] sm:$0xff]  ;;  %v219_v22 = vld [vmem:[#allocation5 + $0x38] sm:$0xff]  ;;  %v236_v23 = vld [vmem:[#allocation5 + $0xc0] sm:$0xff]  ;;  %s777_s18 = scalar_lea.vmem %s776_s7, 4096  ;;  %p778_p10 = scmp.lt.s32.totalorder %s1076_s22, %s776_s7 }
  0x5c   : > { %v237_v24 = vld [vmem:[#allocation5 + $0xc8] sm:$0xff]  ;;  %v616_v27 = vpack.c.bf16 %v219_v22, %v218_v21  ;;  %v220_v29 = vld [vmem:[#allocation5 + $0x40] sm:$0xff]  ;;  %v238_v31 = vld [vmem:[#allocation5 + $0xd0] sm:$0xff]  ;;  %p773_p6 = pnand %p772_p4, %p958_p12  ;;  %p779_p13 = scmp.lt.s32.totalorder %s777_s18, %s771_s5 }
  0x5d   : > { %v181_v25 = vld [vmem:[%s1010_s3 + $0x8] sm:$0xff]  ;;  %v618_v28 = vpack.c.bf16 %v237_v24, %v236_v23  ;;  %v239_v32 = vld [vmem:[#allocation5 + $0xd8] sm:$0xff]  ;;  %v222_v35 = vld [vmem:[#allocation5 + $0x50] sm:$0xff] }
  0x5e   : > { %609 = vmatpush3.bf16.msra.mxu0 %v608_v13  ;;  %643 = vmatpush3.bf16.msra.mxu1 %v608_v13  ;;  %v197_v26 = vld [vmem:[%s1010_s3 + $0x88] sm:$0xff]  ;;  %v622_v34 = vpack.c.bf16 %v239_v32, %v238_v31  ;;  %v223_v36 = vld [vmem:[#allocation5 + $0x58] sm:$0xff]  ;;  %v240_v37 = vld [vmem:[#allocation5 + $0xe0] sm:$0xff]  ;;  %p774_p8 = pneg %p773_p6  ;;  %p780_p3 = por %p779_p13, %p778_p10 }
  0x5f   : > { %611 = vmatprep.subr.bf16.mxu0 %v610_v14  ;;  %636 = vmatprep.subr.bf16.mxu1 %v610_v14  ;;  %v221_v30 = vld [vmem:[#allocation5 + $0x48] sm:$0xff]  ;;  %v624_v39 = vpack.c.bf16 %v223_v36, %v222_v35  ;;  %v224_v41 = vld [vmem:[#allocation5 + $0x60] sm:$0xff]  ;;  %v242_v43 = vld [vmem:[#allocation5 + $0xf0] sm:$0xff] }
  0x60   : > { %308 = vmatprep.mubr.f32.mxu0 %v181_v25  ;;  %348 = vmatprep.mubr.f32.mxu1 %v197_v26  ;;  %v620_v33 = vpack.c.bf16 %v221_v30, %v220_v29  ;;  %v241_v38 = vld [vmem:[#allocation5 + $0xe8] sm:$0xff]  ;;  %v243_v44 = vld [vmem:[#allocation5 + $0xf8] sm:$0xff]  ;;  %v226_v47 = vld [vmem:[#allocation5 + $0x70] sm:$0xff]  ;;  %p781_p7 = pnand %p780_p3, %p774_p8 }
  0x61   : > { %v626_v40 = vpack.c.bf16 %v241_v38, %v240_v37  ;;  %v225_v42 = vld [vmem:[#allocation5 + $0x68] sm:$0xff]  ;;  %v630_v46 = vpack.c.bf16 %v243_v44, %v242_v43  ;;  %v227_v48 = vld [vmem:[#allocation5 + $0x78] sm:$0xff]  ;;  %v180_v50 = vld [vmem:[%s1010_s3] sm:$0xff] }
  0x62   : > { %613 = vmatpush3.bf16.msra.mxu0 %v612_v19  ;;  %644 = vmatpush3.bf16.msra.mxu1 %v612_v19  ;;  %v628_v45 = vpack.c.bf16 %v225_v42, %v224_v41  ;;  %v632_v49 = vpack.c.bf16 %v227_v48, %v226_v47  ;;  %v196_v51 = vld [vmem:[%s1010_s3 + $0x80] sm:$0xff]  ;;  %v183_v52 = vld [vmem:[%s1010_s3 + $0x18] sm:$0xff]  ;;  %v182_v54 = vld [vmem:[%s1010_s3 + $0x10] sm:$0xff] }
  0x63   : > { %615 = vmatprep.subr.bf16.mxu0 %v614_v20  ;;  %637 = vmatprep.subr.bf16.mxu1 %v614_v20  ;;  %v199_v53 = vld [vmem:[%s1010_s3 + $0x98] sm:$0xff]  ;;  %v198_v55 = vld [vmem:[%s1010_s3 + $0x90] sm:$0xff]  ;;  %v185_v56 = vld [vmem:[%s1010_s3 + $0x28] sm:$0xff] }
  0x64   : > { %v201_v57 = vld [vmem:[%s1010_s3 + $0xa8] sm:$0xff]  ;;  %v184_v58 = vld [vmem:[%s1010_s3 + $0x20] sm:$0xff]  ;;  %v187_v60 = vld [vmem:[%s1010_s3 + $0x38] sm:$0xff] }
  0x65   : > { %v200_v59 = vld [vmem:[%s1010_s3 + $0xa0] sm:$0xff]  ;;  %v203_v61 = vld [vmem:[%s1010_s3 + $0xb8] sm:$0xff]  ;;  %v186_v62 = vld [vmem:[%s1010_s3 + $0x30] sm:$0xff] }
  0x66   : > { %617 = vmatpush3.bf16.msra.mxu0 %v616_v27  ;;  %645 = vmatpush3.bf16.msra.mxu1 %v616_v27  ;;  %v202_v63 = vld [vmem:[%s1010_s3 + $0xb0] sm:$0xff]  ;;  %v189_v0 = vld [vmem:[%s1010_s3 + $0x48] sm:$0xff]  ;;  %v188_v2 = vld [vmem:[%s1010_s3 + $0x40] sm:$0xff] }
  0x67   : > { %619 = vmatprep.subr.bf16.mxu0 %v618_v28  ;;  %638 = vmatprep.subr.bf16.mxu1 %v618_v28  ;;  %v205_v1 = vld [vmem:[%s1010_s3 + $0xc8] sm:$0xff]  ;;  %v204_v3 = vld [vmem:[%s1010_s3 + $0xc0] sm:$0xff]  ;;  %v191_v4 = vld [vmem:[%s1010_s3 + $0x58] sm:$0xff] }
  0x68   : > { %v207_v5 = vld [vmem:[%s1010_s3 + $0xd8] sm:$0xff]  ;;  %v190_v6 = vld [vmem:[%s1010_s3 + $0x50] sm:$0xff]  ;;  %v193_v8 = vld [vmem:[%s1010_s3 + $0x68] sm:$0xff] }
  0x69   : > { %v206_v7 = vld [vmem:[%s1010_s3 + $0xd0] sm:$0xff]  ;;  %v209_v9 = vld [vmem:[%s1010_s3 + $0xe8] sm:$0xff]  ;;  %v192_v10 = vld [vmem:[%s1010_s3 + $0x60] sm:$0xff] }
  0x6a   : > { %621 = vmatpush3.bf16.msra.mxu0 %v620_v33  ;;  %646 = vmatpush3.bf16.msra.mxu1 %v620_v33  ;;  %v208_v11 = vld [vmem:[%s1010_s3 + $0xe0] sm:$0xff]  ;;  %v195_v12 = vld [vmem:[%s1010_s3 + $0x78] sm:$0xff]  ;;  %v194_v14 = vld [vmem:[%s1010_s3 + $0x70] sm:$0xff] }
  0x6b   : > { %623 = vmatprep.subr.bf16.mxu0 %v622_v34  ;;  %639 = vmatprep.subr.bf16.mxu1 %v622_v34  ;;  %v211_v13 = vld [vmem:[%s1010_s3 + $0xf8] sm:$0xff]  ;;  %v210_v15 = vld [vmem:[%s1010_s3 + $0xf0] sm:$0xff] }
  0x6e   : > { %625 = vmatpush3.bf16.msra.mxu0 %v624_v39  ;;  %647 = vmatpush3.bf16.msra.mxu1 %v624_v39 }
  0x6f   : > { %627 = vmatprep.subr.bf16.mxu0 %v626_v40  ;;  %640 = vmatprep.subr.bf16.mxu1 %v626_v40 }
  0x72   : > { %629 = vmatpush3.bf16.msra.mxu0 %v628_v45  ;;  %648 = vmatpush3.bf16.msra.mxu1 %v628_v45 }
  0x73   : > { %631 = vmatprep.subr.bf16.mxu0 %v630_v46  ;;  %641 = vmatprep.subr.bf16.mxu1 %v630_v46 }
  0x76   : > { %633 = vmatpush3.bf16.msra.mxu0 %v632_v49  ;;  %649 = vmatpush3.bf16.msra.mxu1 %v632_v49 }
  0x79   : > { %309 = vmatmul.mubr.f32.vlgmr.msra.gmra.mrb[0].mxu0 %v180_v50  ;;  %349 = vmatmul.mubr.f32.vlgmr.msra.gmra.mrb[0].mxu1 %v196_v51 }
  0x7a   : > { %313 = vmatprep.mubr.f32.mxu0 %v183_v52  ;;  %353 = vmatprep.mubr.f32.mxu1 %v199_v53 }
  0x7d   : > { %314 = vmatmul.mubr.f32.gmra.mrb[2].mxu0 %v182_v54  ;;  %354 = vmatmul.mubr.f32.gmra.mrb[2].mxu1 %v198_v55 }
  0x7e   : > { %318 = vmatprep.mubr.f32.mxu0 %v185_v56  ;;  %358 = vmatprep.mubr.f32.mxu1 %v201_v57 }
  0x81   : > { %319 = vmatmul.mubr.f32.gmra.mrb[4].mxu0 %v184_v58  ;;  %359 = vmatmul.mubr.f32.gmra.mrb[4].mxu1 %v200_v59 }
  0x82   : > { %323 = vmatprep.mubr.f32.mxu0 %v187_v60  ;;  %363 = vmatprep.mubr.f32.mxu1 %v203_v61 }
  0x85   : > { %324 = vmatmul.mubr.f32.gmra.mrb[6].mxu0 %v186_v62  ;;  %364 = vmatmul.mubr.f32.gmra.mrb[6].mxu1 %v202_v63 }
  0x86   : > { %328 = vmatprep.mubr.f32.mxu0 %v189_v0  ;;  %368 = vmatprep.mubr.f32.mxu1 %v205_v1 }
  0x89   : > { %329 = vmatmul.mubr.f32.gmra.mrb[8].mxu0 %v188_v2  ;;  %369 = vmatmul.mubr.f32.gmra.mrb[8].mxu1 %v204_v3 }
  0x8a   : > { %333 = vmatprep.mubr.f32.mxu0 %v191_v4  ;;  %373 = vmatprep.mubr.f32.mxu1 %v207_v5 }
  0x8d   : > { %334 = vmatmul.mubr.f32.gmra.mrb[10].mxu0 %v190_v6  ;;  %374 = vmatmul.mubr.f32.gmra.mrb[10].mxu1 %v206_v7 }
  0x8e   : > { %338 = vmatprep.mubr.f32.mxu0 %v193_v8  ;;  %378 = vmatprep.mubr.f32.mxu1 %v209_v9 }
  0x91   : > { %339 = vmatmul.mubr.f32.gmra.mrb[12].mxu0 %v192_v10  ;;  %379 = vmatmul.mubr.f32.gmra.mrb[12].mxu1 %v208_v11 }
  0x92   : > { %343 = vmatprep.mubr.f32.mxu0 %v195_v12  ;;  %383 = vmatprep.mubr.f32.mxu1 %v211_v13 }
  0x95   : > { %344 = vmatmul.mubr.f32.gmra.mrb[14].mxu0 %v194_v14  ;;  %384 = vmatmul.mubr.f32.gmra.mrb[14].mxu1 %v210_v15 }
 0x14c   : > { %v554_v16 = vpop.f32.mrb[0].mxu0  ;;  %v578_v17 = vpop.f32.mrb[0].mxu1 }
 0x14d   : > { %v555_v18 = vpop.f32.mrb[1].mxu0  ;;  %v579_v19 = vpop.f32.mrb[1].mxu1 }
 0x14e   : > { %v556_v20 = vadd.f32 %v555_v18, %v554_v16  ;;  %v580_v21 = vadd.f32 %v579_v19, %v578_v17 }
 0x150   : > { %389 = vst [vmem:[%s1053_s17] sm:$0xff] %v556_v20  ;;  %397 = vst [vmem:[%s1053_s17 + $0x40] sm:$0xff] %v580_v21  ;;  %v557_v22 = vpop.f32.mrb[2].mxu0  ;;  %v581_v23 = vpop.f32.mrb[2].mxu1 }
 0x151   : > { %v558_v24 = vpop.f32.mrb[3].mxu0  ;;  %v582_v25 = vpop.f32.mrb[3].mxu1 }
 0x152   : > { %v559_v26 = vadd.f32 %v558_v24, %v557_v22  ;;  %v583_v27 = vadd.f32 %v582_v25, %v581_v23 }
 0x154   : > { %390 = vst [vmem:[%s1053_s17 + $0x8] sm:$0xff] %v559_v26  ;;  %398 = vst [vmem:[%s1053_s17 + $0x48] sm:$0xff] %v583_v27  ;;  %v560_v28 = vpop.f32.mrb[4].mxu0  ;;  %v584_v29 = vpop.f32.mrb[4].mxu1 }
 0x155   : > { %v561_v30 = vpop.f32.mrb[5].mxu0  ;;  %v585_v31 = vpop.f32.mrb[5].mxu1 }
 0x156   : > { %v562_v32 = vadd.f32 %v561_v30, %v560_v28  ;;  %v586_v33 = vadd.f32 %v585_v31, %v584_v29 }
 0x158   : > { %391 = vst [vmem:[%s1053_s17 + $0x10] sm:$0xff] %v562_v32  ;;  %399 = vst [vmem:[%s1053_s17 + $0x50] sm:$0xff] %v586_v33  ;;  %v563_v34 = vpop.f32.mrb[6].mxu0  ;;  %v587_v35 = vpop.f32.mrb[6].mxu1 }
 0x159   : > { %v564_v36 = vpop.f32.mrb[7].mxu0  ;;  %v588_v37 = vpop.f32.mrb[7].mxu1 }
 0x15a   : > { %v565_v38 = vadd.f32 %v564_v36, %v563_v34  ;;  %v589_v39 = vadd.f32 %v588_v37, %v587_v35 }
 0x15c   : > { %392 = vst [vmem:[%s1053_s17 + $0x18] sm:$0xff] %v565_v38  ;;  %400 = vst [vmem:[%s1053_s17 + $0x58] sm:$0xff] %v589_v39  ;;  %v566_v40 = vpop.f32.mrb[8].mxu0  ;;  %v590_v41 = vpop.f32.mrb[8].mxu1 }
 0x15d   : > { %v567_v42 = vpop.f32.mrb[9].mxu0  ;;  %v591_v43 = vpop.f32.mrb[9].mxu1 }
 0x15e   : > { %v568_v44 = vadd.f32 %v567_v42, %v566_v40  ;;  %v592_v45 = vadd.f32 %v591_v43, %v590_v41 }
 0x160   : > { %393 = vst [vmem:[%s1053_s17 + $0x20] sm:$0xff] %v568_v44  ;;  %401 = vst [vmem:[%s1053_s17 + $0x60] sm:$0xff] %v592_v45  ;;  %v569_v46 = vpop.f32.mrb[10].mxu0  ;;  %v593_v47 = vpop.f32.mrb[10].mxu1 }
 0x161   : > { %v570_v48 = vpop.f32.mrb[11].mxu0  ;;  %v594_v49 = vpop.f32.mrb[11].mxu1 }
 0x162   : > { %v571_v50 = vadd.f32 %v570_v48, %v569_v46  ;;  %v595_v51 = vadd.f32 %v594_v49, %v593_v47 }
 0x164   : > { %394 = vst [vmem:[%s1053_s17 + $0x28] sm:$0xff] %v571_v50  ;;  %402 = vst [vmem:[%s1053_s17 + $0x68] sm:$0xff] %v595_v51  ;;  %v572_v52 = vpop.f32.mrb[12].mxu0  ;;  %v596_v53 = vpop.f32.mrb[12].mxu1 }
 0x165   : > { %v573_v54 = vpop.f32.mrb[13].mxu0  ;;  %v597_v55 = vpop.f32.mrb[13].mxu1 }
 0x166   : > { %v574_v56 = vadd.f32 %v573_v54, %v572_v52  ;;  %v598_v57 = vadd.f32 %v597_v55, %v596_v53 }
 0x168   : > { %395 = vst [vmem:[%s1053_s17 + $0x30] sm:$0xff] %v574_v56  ;;  %403 = vst [vmem:[%s1053_s17 + $0x70] sm:$0xff] %v598_v57  ;;  %v575_v58 = vpop.f32.mrb[14].mxu0  ;;  %v599_v59 = vpop.f32.mrb[14].mxu1 }
 0x169   : > { %v576_v60 = vpop.f32.mrb[15].mxu0  ;;  %v600_v61 = vpop.f32.mrb[15].mxu1 }
 0x16a   : > { %v577_v62 = vadd.f32 %v576_v60, %v575_v58  ;;  %v601_v63 = vadd.f32 %v600_v61, %v599_v59 }
 0x16c   : > { %396 = vst [vmem:[%s1053_s17 + $0x38] sm:$0xff] %v577_v62  ;;  %404 = vst [vmem:[%s1053_s17 + $0x78] sm:$0xff] %v601_v63 }
 0x16d   : > { %784 = shalt.err (!%p781_p7)
}
 0x16e   : > { %s785_s24 = scalar_lea.hbm %s1074_s4, 2048  ;;  %s789_s26 = scalar_lea.hbm %s1124_s2, 4096 }
 0x16f   : > { %p786_p9 = scmp.ne.s32.totalorder %s1074_s4, %s785_s24  ;;  %p790_p5 = scmp.lt.u32.totalorder %s1074_s4, %s1124_s2 }
 0x170   : > { %p791_p11 = scmp.lt.u32.totalorder %s789_s26, %s785_s24  ;;  %p793_p4 = scmp.lt.u32.totalorder %s785_s24, %s1074_s4 }
 0x171   : > { %p787_p2 = pnand %p786_p9, %p958_p12 }
 0x172   : > { %p792_p1 = por %p791_p11, %p790_p5 }
 0x173   : > { %p788_p0 = pneg %p787_p2 }
 0x174   : > { %p794_p6 = por %p793_p4, %p792_p1 }
 0x176   : > { %p795_p8 = pnand %p794_p6, %p788_p0 }
 0x178   : > { %798 = shalt.err (!%p795_p8)
}
 0x179   : > { %s850_s3 = smov 128   ;;  %s851_s15 = smov 8  }
 0x17a   : > { %656 = dma.vmem_to_hbm [thread:$0]  (%p958_p12), %s1076_s22, 2048, %s1074_s4, %s406_s13, %s850_s3, %s850_s3, %s851_s15  }
 0x17b PF: > { %s434_s17 = sand.u32 1, %s829_s9   ;;  %p1139_p10 = scmp.ne.s32.totalorder %s1129_s16, 0 }
 0x17c   : > { %p1140_p13 = scmp.ge.s32.totalorder %s841_s12, 2  ;;  %s435_s27 = scalar_lea.sflag [#allocation4], %s434_s17 }
 0x17e   : > { %p667_p3 = pnand %p1140_p13, %p1139_p10 }
 0x180   : > { %824 = dma.done.wait (!%p667_p3), %s435_s27, 2048  }
 0x181   : > { %826 = vsyncadd (!%p667_p3), %s435_s27, 4294965248  ;;  %p16_p7 = scmp.ge.s32.totalorder %s923_s21, 4   ;;  %s1141_s9 = smov %s833_s10 }
 0x182   : > { %s1142_s10 = smov %s837_s11  ;;  %s1143_s11 = smov %s954_s8 }
 0x183   : > { %s1144_s12 = smov %s923_s21  ;;  %18 = sbr.rel (!%p16_p7) target bundleno = 6 (0x6), region = 77 }
 0x18a   :  { %440 = vsyncpa [#allocation3], 1 }
 0x18b   :  { %442 = vsyncpa [#allocation3 + $0x1], 1 }
 0x18c   :  { %443 = vsyncpa [#allocation6], 1 }
 0x18d   :  { %444 = vsyncpa [#allocation4], 1 }
 0x18e   :  { %446 = vsyncpa [#allocation4 + $0x1], 1 }

</bundles_post_ra>
